<compile_context>
chip_gen: v5e
topology: v5e:2x2
jax: 0.10.0
libtpu: 0.0.40
codegen_flags: <defaults>
</compile_context>

<pallas_src>
import functools
import math

import jax
import jax.numpy as jnp
from jax import lax
from jax.experimental import pallas as pl
from jax.experimental.pallas import tpu as pltpu


def _ceil_div(a, b):
    return -(-a // b)


def _layer_norm(y, gamma, beta, eps=1e-5):
    # nn.LayerNorm semantics: biased variance over the last dim, eps=1e-5.
    mu = jnp.mean(y, axis=-1, keepdims=True)
    var = jnp.mean((y - mu) ** 2, axis=-1, keepdims=True)
    return (y - mu) * lax.rsqrt(var + eps) * gamma + beta


# --------------------- kernel 1: K / V projections (bf16) ---------------------
def _kv_proj_kernel(x_ref, wk_ref, bk_ref, wv_ref, bv_ref, k_ref, v_ref):
    xt = x_ref[0]                                                   # (TKV, D) bf16
    k = jnp.dot(xt, wk_ref[...], preferred_element_type=jnp.float32) + bk_ref[...]
    v = jnp.dot(xt, wv_ref[...], preferred_element_type=jnp.float32) + bv_ref[...]
    k_ref[0] = k.astype(jnp.bfloat16)
    v_ref[0] = v.astype(jnp.bfloat16)


# ----------------- kernel 2: attention + FFN + residual LayerNorms -----------
def _attn_ffn_kernel(
    x_q_ref, k_ref, v_ref,
    wq_ref, bq_ref, wo_ref, bo_ref,
    g1_ref, be1_ref,
    w1_ref, b1_ref, w2_ref, b2_ref,
    g2_ref, be2_ref,
    o_ref,
    *, nhead, h_block, seq_len,
):
    TQ = x_q_ref.shape[1]
    D = x_q_ref.shape[2]
    S_pad = k_ref.shape[1]
    dh = D // nhead

    x_res = x_q_ref[0].astype(jnp.float32)                          # (TQ, D) residual, fp32
    xq_bf = x_res.astype(jnp.bfloat16)

    # q projection; 1/sqrt(dh) already folded into wq / bq by the wrapper
    q = jnp.dot(xq_bf, wq_ref[...], preferred_element_type=jnp.float32) + bq_ref[...]

    k_all = k_ref[0]                                                # (S_pad, D) bf16
    v_all = v_ref[0]

    need_mask = seq_len != S_pad                                    # static (trace-time)
    if need_mask:
        col = lax.broadcasted_iota(jnp.int32, (TQ, S_pad), 1)
        key_mask = col < seq_len

    # TODO(synk): switch to lax.fori_loop over heads (bounded live ranges) once
    # dynamic lane-dim slicing is robust for dh < 128; static loop keeps
    # lowering safe across dh sizes.
    attn = jnp.zeros((TQ, D), jnp.float32)
    for h in range(nhead):                                          # static trace-time loop
        sl = slice(h * dh, (h + 1) * dh)
        qh = q[:, sl].astype(jnp.bfloat16)                          # (TQ, dh)
        kh = k_all[:, sl]                                           # (S_pad, dh)
        vh = v_all[:, sl]
        # contract last dims of both operands -> (TQ, S_pad); no transpose
        s = lax.dot_general(qh, kh, (((1,), (1,)), ((), ())),
                            preferred_element_type=jnp.float32)
        if need_mask:
            s = jnp.where(key_mask, s, -1e30)                       # mask padded keys
        s = s - jnp.max(s, axis=-1, keepdims=True)
        # TODO(synk): bf16 exp on v6e/v7x (2x EUP throughput); fp32 kept for v5e.
        p = jnp.exp(s)
        denom = jnp.sum(p, axis=-1, keepdims=True)
        ctx_h = jnp.dot(p.astype(jnp.bfloat16), vh,
                        preferred_element_type=jnp.float32)         # (TQ, dh)
        # normalize the small (TQ, dh) context, not the (TQ, S) probabilities
        ctx_h = ctx_h * pl.reciprocal(denom, approx=True)
        # per-head slice of the output projection -> no concatenate needed
        attn = attn + jnp.dot(ctx_h.astype(jnp.bfloat16), wo_ref[h],
                              preferred_element_type=jnp.float32)
    attn = attn + bo_ref[...]

    # dropout(p) is identity in eval mode
    out1 = _layer_norm(attn + x_res, g1_ref[...], be1_ref[...])

    # ---- positionwise feed-forward, blocked over the (zero-padded) hidden dim
    out1_bf = out1.astype(jnp.bfloat16)
    Hp = w1_ref.shape[1]
    ff = jnp.zeros((TQ, D), jnp.float32)
    for hb in range(0, Hp, h_block):                                # static trace-time loop
        h1 = jnp.dot(out1_bf, w1_ref[:, hb:hb + h_block],
                     preferred_element_type=jnp.float32) + b1_ref[:, hb:hb + h_block]
        h1 = jnp.maximum(h1, 0.0)                                   # ReLU
        ff = ff + jnp.dot(h1.astype(jnp.bfloat16), w2_ref[hb:hb + h_block, :],
                          preferred_element_type=jnp.float32)
    ff = ff + b2_ref[...]

    out2 = _layer_norm(ff + out1, g2_ref[...], be2_ref[...])
    o_ref[0] = out2.astype(o_ref.dtype)


def _vmem_ceiling_bytes():
    """~52 MiB on v7x (64 MiB physical per TC), ~100 MiB on v5e/v6e (128 MiB)."""
    kind = ""
    try:
        kind = jax.devices()[0].device_kind.lower()
    except Exception:
        pass
    if "7" in kind:
        return 52 * 1024 * 1024
    return 100 * 1024 * 1024


def _forward(x_pad, x_bf, w, *, nhead, TQ, HBLK, seq_len, out_dtype, single_buffer):
    B, S_pad, D = x_pad.shape
    H_pad = w["w1"].shape[1]
    dh = D // nhead
    n_qt = S_pad // TQ
    ceiling = _vmem_ceiling_bytes()

    # single-buffer grid-invariant operands (their index_map is constant)
    pm = pl.Buffered(1) if (single_buffer and hasattr(pl, "Buffered")) else None

    def const(shape):
        n = len(shape)
        return pl.BlockSpec(shape, lambda b, t, n=n: (0,) * n, pipeline_mode=pm)

    # ---------------- kernel 1: K / V projection ----------------
    kv_est = int(1.5 * (2 * 2 * D * D + 2 * 2 * 3 * TQ * D + 4 * 4 * TQ * D))
    kv_vmem = int(min(max(kv_est, 32 * 1024 * 1024), ceiling))
    k_pad, v_pad = pl.pallas_call(
        _kv_proj_kernel,
        out_shape=(jax.ShapeDtypeStruct((B, S_pad, D), jnp.bfloat16),
                   jax.ShapeDtypeStruct((B, S_pad, D), jnp.bfloat16)),
        grid_spec=pltpu.PrefetchScalarGridSpec(
            num_scalar_prefetch=0,
            grid=(B, n_qt),
            in_specs=[
                pl.BlockSpec((1, TQ, D), lambda b, t: (b, t, 0)),   # x (bf16)
                const((D, D)), const((1, D)),                        # wk, bk
                const((D, D)), const((1, D)),                        # wv, bv
            ],
            out_specs=[
                pl.BlockSpec((1, TQ, D), lambda b, t: (b, t, 0)),
                pl.BlockSpec((1, TQ, D), lambda b, t: (b, t, 0)),
            ],
        ),
        compiler_params=pltpu.CompilerParams(
            dimension_semantics=("parallel", "parallel"),
            vmem_limit_bytes=kv_vmem,
        ),
    )(x_bf, w["wk"], w["bk"], w["wv"], w["bv"])

    # ---------------- kernel 2: attention + FFN ----------------
    in_specs = [
        pl.BlockSpec((1, TQ, D), lambda b, t: (b, t, 0)),            # x (fp32) q-tile / residual
        pl.BlockSpec((1, S_pad, D), lambda b, t: (b, 0, 0), pipeline_mode=pm),  # K (bf16)
        pl.BlockSpec((1, S_pad, D), lambda b, t: (b, 0, 0), pipeline_mode=pm),  # V (bf16)
        const((D, D)), const((1, D)),                                # wq (pre-scaled), bq
        const((nhead, dh, D)), const((1, D)),                        # wo (head-split), bo
        const((1, D)), const((1, D)),                                # ln1 gamma, beta
        const((D, H_pad)), const((1, H_pad)),                        # w1, b1
        const((H_pad, D)), const((1, D)),                            # w2, b2
        const((1, D)), const((1, D)),                                # ln2 gamma, beta
    ]
    out_spec = pl.BlockSpec((1, TQ, D), lambda b, t: (b, t, 0))

    w_bytes = 2 * (2 * D * D + 2 * D * H_pad)                        # bf16 weights (single buf)
    kv_bytes = (1 if single_buffer else 2) * 2 * 2 * S_pad * D       # bf16 K, V blocks
    io_bytes = 2 * 4 * 2 * TQ * D                                    # fp32 x / out, double-buffered
    tmp_bytes = 4 * (3 * TQ * S_pad + 2 * TQ * HBLK + 10 * TQ * D)   # fp32 temporaries
    est = int(1.5 * (w_bytes + kv_bytes + io_bytes + tmp_bytes))
    vmem_limit = int(min(max(est, 32 * 1024 * 1024), ceiling))

    kernel = functools.partial(_attn_ffn_kernel, nhead=nhead, h_block=HBLK,
                               seq_len=seq_len)

    return pl.pallas_call(
        kernel,
        out_shape=jax.ShapeDtypeStruct((B, S_pad, D), out_dtype),
        grid_spec=pltpu.PrefetchScalarGridSpec(
            num_scalar_prefetch=0,
            grid=(B, n_qt),
            in_specs=in_specs,
            out_specs=out_spec,
        ),
        compiler_params=pltpu.CompilerParams(
            dimension_semantics=("parallel", "parallel"),
            vmem_limit_bytes=vmem_limit,
        ),
    )(
        x_pad, k_pad, v_pad,
        w["wq"], w["bq"], w["wo"], w["bo"],
        w["ln1_g"], w["ln1_b"],
        w["w1"], w["b1"], w["w2"], w["b2"],
        w["ln2_g"], w["ln2_b"],
    )


def encoder_layer(x, params, *, nhead, q_block=256, h_block=512):
    B, S, D = x.shape
    H = params["w1"].shape[1]
    assert D % nhead == 0, "d_model must be divisible by nhead"
    dh = D // nhead
    scale = 1.0 / math.sqrt(dh)
    bf16 = jnp.bfloat16

    # sequence tile: pad S up to a multiple of TQ (padded keys masked in-kernel)
    if S <= q_block:
        TQ, S_pad = S, S
    else:
        TQ = q_block
        S_pad = _ceil_div(S, TQ) * TQ

    # FFN hidden block: zero-pad H up to a multiple of HBLK (padding contributes 0)
    HBLK = H if H <= h_block else h_block
    H_pad = _ceil_div(H, HBLK) * HBLK

    w1, b1, w2 = params["w1"], params["b1"], params["w2"]
    if H_pad != H:
        w1 = jnp.pad(w1, ((0, 0), (0, H_pad - H)))
        b1 = jnp.pad(b1, ((0, 0), (0, H_pad - H)))
        w2 = jnp.pad(w2, ((0, H_pad - H), (0, 0)))

    weights = {
        # 1/sqrt(dh) folded into the q projection (free host-side scale)
        "wq": (params["wq"] * scale).astype(bf16),
        "bq": params["bq"] * scale,
        "wk": params["wk"].astype(bf16), "bk": params["bk"],
        "wv": params["wv"].astype(bf16), "bv": params["bv"],
        "wo": params["wo"].reshape(nhead, dh, D).astype(bf16),
        "bo": params["bo"],
        "ln1_g": params["ln1_g"], "ln1_b": params["ln1_b"],
        "w1": w1.astype(bf16), "b1": b1,
        "w2": w2.astype(bf16), "b2": params["b2"],
        "ln2_g": params["ln2_g"], "ln2_b": params["ln2_b"],
    }

    x_pad = x if S_pad == S else jnp.pad(x, ((0, 0), (0, S_pad - S), (0, 0)))
    x_bf = x_pad.astype(bf16)   # bf16 copy feeds the K/V projection (half the HBM fetch)

    run = functools.partial(
        _forward, x_pad, x_bf, weights,
        nhead=nhead, TQ=TQ, HBLK=HBLK, seq_len=S, out_dtype=x.dtype,
    )
    try:
        out = run(single_buffer=True)
        out = jax.block_until_ready(out)
    except Exception:
        # pipeline_mode=pl.Buffered(1) rejected -> default double buffering
        out = run(single_buffer=False)

    if S_pad != S:
        out = out[:, :S, :]
    return out


def init_params(key, d_model, d_hidden):
    ks = jax.random.split(key, 6)
    init = lambda k, shape: (0.02 * jax.random.normal(k, shape)).astype(jnp.float32)
    zeros = lambda n: jnp.zeros((1, n), jnp.float32)
    ones = lambda n: jnp.ones((1, n), jnp.float32)
    return {
        "wq": init(ks[0], (d_model, d_model)), "bq": zeros(d_model),
        "wk": init(ks[1], (d_model, d_model)), "bk": zeros(d_model),
        "wv": init(ks[2], (d_model, d_model)), "bv": zeros(d_model),
        "wo": init(ks[3], (d_model, d_model)), "bo": zeros(d_model),
        "ln1_g": ones(d_model), "ln1_b": zeros(d_model),
        "w1": init(ks[4], (d_model, d_hidden)), "b1": zeros(d_hidden),
        "w2": init(ks[5], (d_hidden, d_model)), "b2": zeros(d_model),
        "ln2_g": ones(d_model), "ln2_b": zeros(d_model),
    }


def _reference(x, p, nhead):
    """Pure-JAX fp32 reference matching the PyTorch module (eval mode)."""
    B, S, D = x.shape
    dh = D // nhead

    def ln(y, g, b, eps=1e-5):
        mu = jnp.mean(y, -1, keepdims=True)
        var = jnp.mean((y - mu) ** 2, -1, keepdims=True)
        return (y - mu) / jnp.sqrt(var + eps) * g + b

    q = x @ p["wq"] + p["bq"]
    k = x @ p["wk"] + p["bk"]
    v = x @ p["wv"] + p["bv"]
    q = q.reshape(B, S, nhead, dh).transpose(0, 2, 1, 3)
    k = k.reshape(B, S, nhead, dh).transpose(0, 2, 1, 3)
    v = v.reshape(B, S, nhead, dh).transpose(0, 2, 1, 3)
    s = jnp.einsum("bhqd,bhkd->bhqk", q, k) / math.sqrt(dh)
    pattn = jax.nn.softmax(s, axis=-1)
    ctx = jnp.einsum("bhqk,bhkd->bhqd", pattn, v).transpose(0, 2, 1, 3).reshape(B, S, D)
    attn = ctx @ p["wo"] + p["bo"]
    out1 = ln(attn + x, p["ln1_g"], p["ln1_b"])
    ff = jnp.maximum(out1 @ p["w1"] + p["b1"], 0.0) @ p["w2"] + p["b2"]
    return ln(ff + out1, p["ln2_g"], p["ln2_b"])


if __name__ == "__main__":
    B, S, D, NHEAD, HIDDEN = 2, 8, 32, 4, 64

    key = jax.random.PRNGKey(0)
    kx, kp = jax.random.split(key)
    x = jax.random.normal(kx, (B, S, D), dtype=jnp.float32)
    params = init_params(kp, D, HIDDEN)

    out = encoder_layer(x, params, nhead=NHEAD)
    out = jax.block_until_ready(out)

    ref = _reference(x, params, NHEAD)
    assert out.shape == (B, S, D)
    err = float(jnp.max(jnp.abs(out - ref)))
    # bf16 matmul operands + approx reciprocal -> loosened (but tight) tolerance
    assert err < 2e-2, f"mismatch vs pure-JAX reference: {err}"

    print("KERNEL_OK")
</pallas_src>

<mosaic_0001>
module attributes {stable_mosaic.version = 11 : i64} {
  func.func @_kv_proj_kernel(%arg0: i32, %arg1: i32, %arg2: memref<1x8x32xbf16, #tpu.memory_space<vmem>>, %arg3: memref<32x32xbf16, #tpu.memory_space<vmem>>, %arg4: memref<1x32xf32, #tpu.memory_space<vmem>>, %arg5: memref<32x32xbf16, #tpu.memory_space<vmem>>, %arg6: memref<1x32xf32, #tpu.memory_space<vmem>>, %arg7: memref<1x8x32xbf16, #tpu.memory_space<vmem>>, %arg8: memref<1x8x32xbf16, #tpu.memory_space<vmem>>) attributes {dimension_semantics = [#tpu.dimension_semantics<parallel>, #tpu.dimension_semantics<parallel>], iteration_bounds = array<i64: 2, 1>, scalar_prefetch = 0 : i64, scratch_operands = 0 : i64, tpu.core_type = #tpu.core_type<tc>, window_params = [{transform_indices = @transform_0, window_bounds = array<i64: 1, 8, 32>}, {pipeline_mode = #tpu.pipeline_mode<synchronous>, transform_indices = @transform_1, window_bounds = array<i64: 32, 32>}, {pipeline_mode = #tpu.pipeline_mode<synchronous>, transform_indices = @transform_2, window_bounds = array<i64: 1, 32>}, {pipeline_mode = #tpu.pipeline_mode<synchronous>, transform_indices = @transform_3, window_bounds = array<i64: 32, 32>}, {pipeline_mode = #tpu.pipeline_mode<synchronous>, transform_indices = @transform_4, window_bounds = array<i64: 1, 32>}, {transform_indices = @transform_5, window_bounds = array<i64: 1, 8, 32>}, {transform_indices = @transform_6, window_bounds = array<i64: 1, 8, 32>}]} {
    %c0 = arith.constant 0 : index
    %c0_0 = arith.constant 0 : index
    %c0_1 = arith.constant 0 : index
    %0 = vector.load %arg2[%c0, %c0_0, %c0_1] : memref<1x8x32xbf16, #tpu.memory_space<vmem>>, vector<1x8x32xbf16>
    %1 = vector.shape_cast %0 : vector<1x8x32xbf16> to vector<8x32xbf16>
    %c0_2 = arith.constant 0 : index
    %c0_3 = arith.constant 0 : index
    %2 = vector.load %arg3[%c0_2, %c0_3] : memref<32x32xbf16, #tpu.memory_space<vmem>>, vector<32x32xbf16>
    %cst = arith.constant dense<0.000000e+00> : vector<8x32xf32>
    %3 = tpu.matmul %1, %2, %cst {dimension_numbers = #tpu.dot_dimension_numbers<[1], [0], [0], [1], [0, 0, 1, 1], [], []>} : vector<8x32xbf16>, vector<32x32xbf16>, vector<8x32xf32> -> vector<8x32xf32>
    %c0_4 = arith.constant 0 : index
    %c0_5 = arith.constant 0 : index
    %4 = vector.load %arg4[%c0_4, %c0_5] : memref<1x32xf32, #tpu.memory_space<vmem>>, vector<1x32xf32>
    %5 = vector.broadcast %4 : vector<1x32xf32> to vector<8x32xf32>
    %6 = arith.addf %3, %5 : vector<8x32xf32>
    %c0_6 = arith.constant 0 : index
    %c0_7 = arith.constant 0 : index
    %7 = vector.load %arg5[%c0_6, %c0_7] : memref<32x32xbf16, #tpu.memory_space<vmem>>, vector<32x32xbf16>
    %cst_8 = arith.constant dense<0.000000e+00> : vector<8x32xf32>
    %8 = tpu.matmul %1, %7, %cst_8 {dimension_numbers = #tpu.dot_dimension_numbers<[1], [0], [0], [1], [0, 0, 1, 1], [], []>} : vector<8x32xbf16>, vector<32x32xbf16>, vector<8x32xf32> -> vector<8x32xf32>
    %c0_9 = arith.constant 0 : index
    %c0_10 = arith.constant 0 : index
    %9 = vector.load %arg6[%c0_9, %c0_10] : memref<1x32xf32, #tpu.memory_space<vmem>>, vector<1x32xf32>
    %10 = vector.broadcast %9 : vector<1x32xf32> to vector<8x32xf32>
    %11 = arith.addf %8, %10 : vector<8x32xf32>
    %12 = arith.truncf %6 : vector<8x32xf32> to vector<8x32xbf16>
    %c0_11 = arith.constant 0 : index
    %c0_12 = arith.constant 0 : index
    %c0_13 = arith.constant 0 : index
    %13 = vector.load %arg7[%c0_11, %c0_12, %c0_13] : memref<1x8x32xbf16, #tpu.memory_space<vmem>>, vector<1x8x32xbf16>
    %14 = vector.shape_cast %13 : vector<1x8x32xbf16> to vector<8x32xbf16>
    %15 = vector.shape_cast %12 : vector<8x32xbf16> to vector<1x8x32xbf16>
    tpu.vector_store %arg7[%c0_11, %c0_12, %c0_13], %15 {strides = array<i32>} : memref<1x8x32xbf16, #tpu.memory_space<vmem>>, vector<1x8x32xbf16>,
    %16 = arith.truncf %11 : vector<8x32xf32> to vector<8x32xbf16>
    %c0_14 = arith.constant 0 : index
    %c0_15 = arith.constant 0 : index
    %c0_16 = arith.constant 0 : index
    %17 = vector.load %arg8[%c0_14, %c0_15, %c0_16] : memref<1x8x32xbf16, #tpu.memory_space<vmem>>, vector<1x8x32xbf16>
    %18 = vector.shape_cast %17 : vector<1x8x32xbf16> to vector<8x32xbf16>
    %19 = vector.shape_cast %16 : vector<8x32xbf16> to vector<1x8x32xbf16>
    tpu.vector_store %arg8[%c0_14, %c0_15, %c0_16], %19 {strides = array<i32>} : memref<1x8x32xbf16, #tpu.memory_space<vmem>>, vector<1x8x32xbf16>,
    return
  }
  func.func @transform_0(%arg0: i32, %arg1: i32) -> (i32, i32, i32) {
    %c0_i32 = arith.constant 0 : i32
    %c0_i32_0 = arith.constant 0 : i32
    return %arg0, %arg1, %c0_i32 : i32, i32, i32
  }
  func.func @transform_1(%arg0: i32, %arg1: i32) -> (i32, i32) {
    %c0_i32 = arith.constant 0 : i32
    %c0_i32_0 = arith.constant 0 : i32
    %c0_i32_1 = arith.constant 0 : i32
    return %c0_i32, %c0_i32_0 : i32, i32
  }
  func.func @transform_2(%arg0: i32, %arg1: i32) -> (i32, i32) {
    %c0_i32 = arith.constant 0 : i32
    %c0_i32_0 = arith.constant 0 : i32
    %c0_i32_1 = arith.constant 0 : i32
    return %c0_i32, %c0_i32_0 : i32, i32
  }
  func.func @transform_3(%arg0: i32, %arg1: i32) -> (i32, i32) {
    %c0_i32 = arith.constant 0 : i32
    %c0_i32_0 = arith.constant 0 : i32
    %c0_i32_1 = arith.constant 0 : i32
    return %c0_i32, %c0_i32_0 : i32, i32
  }
  func.func @transform_4(%arg0: i32, %arg1: i32) -> (i32, i32) {
    %c0_i32 = arith.constant 0 : i32
    %c0_i32_0 = arith.constant 0 : i32
    %c0_i32_1 = arith.constant 0 : i32
    return %c0_i32, %c0_i32_0 : i32, i32
  }
  func.func @transform_5(%arg0: i32, %arg1: i32) -> (i32, i32, i32) {
    %c0_i32 = arith.constant 0 : i32
    %c0_i32_0 = arith.constant 0 : i32
    return %arg0, %arg1, %c0_i32 : i32, i32, i32
  }
  func.func @transform_6(%arg0: i32, %arg1: i32) -> (i32, i32, i32) {
    %c0_i32 = arith.constant 0 : i32
    %c0_i32_0 = arith.constant 0 : i32
    return %arg0, %arg1, %c0_i32 : i32, i32, i32
  }
}

module attributes {stable_mosaic.version = 11 : i64} {
  func.func @_kv_proj_kernel(%arg0: i32, %arg1: i32, %arg2: memref<1x8x32xbf16, #tpu.memory_space<vmem>>, %arg3: memref<32x32xbf16, #tpu.memory_space<vmem>>, %arg4: memref<1x32xf32, #tpu.memory_space<vmem>>, %arg5: memref<32x32xbf16, #tpu.memory_space<vmem>>, %arg6: memref<1x32xf32, #tpu.memory_space<vmem>>, %arg7: memref<1x8x32xbf16, #tpu.memory_space<vmem>>, %arg8: memref<1x8x32xbf16, #tpu.memory_space<vmem>>) attributes {dimension_semantics = [#tpu.dimension_semantics<parallel>, #tpu.dimension_semantics<parallel>], iteration_bounds = array<i64: 2, 1>, scalar_prefetch = 0 : i64, scratch_operands = 0 : i64, tpu.core_type = #tpu.core_type<tc>, window_params = [{transform_indices = @transform_0, window_bounds = array<i64: 1, 8, 32>}, {pipeline_mode = #tpu.pipeline_mode<synchronous>, transform_indices = @transform_1, window_bounds = array<i64: 32, 32>}, {pipeline_mode = #tpu.pipeline_mode<synchronous>, transform_indices = @transform_2, window_bounds = array<i64: 1, 32>}, {pipeline_mode = #tpu.pipeline_mode<synchronous>, transform_indices = @transform_3, window_bounds = array<i64: 32, 32>}, {pipeline_mode = #tpu.pipeline_mode<synchronous>, transform_indices = @transform_4, window_bounds = array<i64: 1, 32>}, {transform_indices = @transform_5, window_bounds = array<i64: 1, 8, 32>}, {transform_indices = @transform_6, window_bounds = array<i64: 1, 8, 32>}]} {
    %c0 = arith.constant 0 : index
    %c0_0 = arith.constant 0 : index
    %c0_1 = arith.constant 0 : index
    %0 = vector.load %arg2[%c0, %c0_0, %c0_1] : memref<1x8x32xbf16, #tpu.memory_space<vmem>>, vector<1x8x32xbf16>
    %1 = vector.shape_cast %0 : vector<1x8x32xbf16> to vector<8x32xbf16>
    %c0_2 = arith.constant 0 : index
    %c0_3 = arith.constant 0 : index
    %2 = vector.load %arg3[%c0_2, %c0_3] : memref<32x32xbf16, #tpu.memory_space<vmem>>, vector<32x32xbf16>
    %cst = arith.constant dense<0.000000e+00> : vector<8x32xf32>
    %3 = tpu.matmul %1, %2, %cst {dimension_numbers = #tpu.dot_dimension_numbers<[1], [0], [0], [1], [0, 0, 1, 1], [], []>} : vector<8x32xbf16>, vector<32x32xbf16>, vector<8x32xf32> -> vector<8x32xf32>
    %c0_4 = arith.constant 0 : index
    %c0_5 = arith.constant 0 : index
    %4 = vector.load %arg4[%c0_4, %c0_5] : memref<1x32xf32, #tpu.memory_space<vmem>>, vector<1x32xf32>
    %5 = vector.broadcast %4 : vector<1x32xf32> to vector<8x32xf32>
    %6 = arith.addf %3, %5 : vector<8x32xf32>
    %c0_6 = arith.constant 0 : index
    %c0_7 = arith.constant 0 : index
    %7 = vector.load %arg5[%c0_6, %c0_7] : memref<32x32xbf16, #tpu.memory_space<vmem>>, vector<32x32xbf16>
    %cst_8 = arith.constant dense<0.000000e+00> : vector<8x32xf32>
    %8 = tpu.matmul %1, %7, %cst_8 {dimension_numbers = #tpu.dot_dimension_numbers<[1], [0], [0], [1], [0, 0, 1, 1], [], []>} : vector<8x32xbf16>, vector<32x32xbf16>, vector<8x32xf32> -> vector<8x32xf32>
    %c0_9 = arith.constant 0 : index
    %c0_10 = arith.constant 0 : index
    %9 = vector.load %arg6[%c0_9, %c0_10] : memref<1x32xf32, #tpu.memory_space<vmem>>, vector<1x32xf32>
    %10 = vector.broadcast %9 : vector<1x32xf32> to vector<8x32xf32>
    %11 = arith.addf %8, %10 : vector<8x32xf32>
    %12 = arith.truncf %6 : vector<8x32xf32> to vector<8x32xbf16>
    %c0_11 = arith.constant 0 : index
    %c0_12 = arith.constant 0 : index
    %c0_13 = arith.constant 0 : index
    %13 = vector.load %arg7[%c0_11, %c0_12, %c0_13] : memref<1x8x32xbf16, #tpu.memory_space<vmem>>, vector<1x8x32xbf16>
    %14 = vector.shape_cast %13 : vector<1x8x32xbf16> to vector<8x32xbf16>
    %15 = vector.shape_cast %12 : vector<8x32xbf16> to vector<1x8x32xbf16>
    tpu.vector_store %arg7[%c0_11, %c0_12, %c0_13], %15 {strides = array<i32>} : memref<1x8x32xbf16, #tpu.memory_space<vmem>>, vector<1x8x32xbf16>,
    %16 = arith.truncf %11 : vector<8x32xf32> to vector<8x32xbf16>
    %c0_14 = arith.constant 0 : index
    %c0_15 = arith.constant 0 : index
    %c0_16 = arith.constant 0 : index
    %17 = vector.load %arg8[%c0_14, %c0_15, %c0_16] : memref<1x8x32xbf16, #tpu.memory_space<vmem>>, vector<1x8x32xbf16>
    %18 = vector.shape_cast %17 : vector<1x8x32xbf16> to vector<8x32xbf16>
    %19 = vector.shape_cast %16 : vector<8x32xbf16> to vector<1x8x32xbf16>
    tpu.vector_store %arg8[%c0_14, %c0_15, %c0_16], %19 {strides = array<i32>} : memref<1x8x32xbf16, #tpu.memory_space<vmem>>, vector<1x8x32xbf16>,
    return
  }
  func.func @transform_0(%arg0: i32, %arg1: i32) -> (i32, i32, i32) {
    %c0_i32 = arith.constant 0 : i32
    %c0_i32_0 = arith.constant 0 : i32
    return %arg0, %arg1, %c0_i32 : i32, i32, i32
  }
  func.func @transform_1(%arg0: i32, %arg1: i32) -> (i32, i32) {
    %c0_i32 = arith.constant 0 : i32
    %c0_i32_0 = arith.constant 0 : i32
    %c0_i32_1 = arith.constant 0 : i32
    return %c0_i32, %c0_i32_0 : i32, i32
  }
  func.func @transform_2(%arg0: i32, %arg1: i32) -> (i32, i32) {
    %c0_i32 = arith.constant 0 : i32
    %c0_i32_0 = arith.constant 0 : i32
    %c0_i32_1 = arith.constant 0 : i32
    return %c0_i32, %c0_i32_0 : i32, i32
  }
  func.func @transform_3(%arg0: i32, %arg1: i32) -> (i32, i32) {
    %c0_i32 = arith.constant 0 : i32
    %c0_i32_0 = arith.constant 0 : i32
    %c0_i32_1 = arith.constant 0 : i32
    return %c0_i32, %c0_i32_0 : i32, i32
  }
  func.func @transform_4(%arg0: i32, %arg1: i32) -> (i32, i32) {
    %c0_i32 = arith.constant 0 : i32
    %c0_i32_0 = arith.constant 0 : i32
    %c0_i32_1 = arith.constant 0 : i32
    return %c0_i32, %c0_i32_0 : i32, i32
  }
  func.func @transform_5(%arg0: i32, %arg1: i32) -> (i32, i32, i32) {
    %c0_i32 = arith.constant 0 : i32
    %c0_i32_0 = arith.constant 0 : i32
    return %arg0, %arg1, %c0_i32 : i32, i32, i32
  }
  func.func @transform_6(%arg0: i32, %arg1: i32) -> (i32, i32, i32) {
    %c0_i32 = arith.constant 0 : i32
    %c0_i32_0 = arith.constant 0 : i32
    return %arg0, %arg1, %c0_i32 : i32, i32, i32
  }
}

</mosaic_0001>

<bundles_post_ra>
// kernel: tpu_custom_call.1
= control target key start
LH: loop header
LB: loop body
LE: loop exit
PB: predicated region body
PF: predicated region fallthrough
CT: control target
= control target key end

     0   :  { %s1145_s0 = inlined_call_operand.hbm [shape: bf16[2,8,32], index: 0, kind: input, shape index: {}]   ;;  %s1146_s1 = inlined_call_operand.hbm [shape: bf16[32,32], index: 1, kind: input, shape index: {}]   ;;  %s1147_s2 = inlined_call_operand.vmem [shape: f32[1,32], index: 2, kind: input, shape index: {}]   ;;  %s1148_s3 = inlined_call_operand.hbm [shape: bf16[32,32], index: 3, kind: input, shape index: {}]   ;;  %s1149_s4 = inlined_call_operand.vmem [shape: f32[1,32], index: 4, kind: input, shape index: {}]   ;;  %s1150_s5 = inlined_call_operand.hbm [shape: bf16[2,8,32], index: 5, kind: output, shape index: {0}]   ;;  %s1151_s6 = inlined_call_operand.hbm [shape: bf16[2,8,32], index: 6, kind: output, shape index: {1}]  }
   0x1   :  { %1152 = sst [smem:[#allocation15_spill]] %s1146_s1 }
   0x2   :  { %12 = vsyncpa [#allocation3], 0 }
   0x3   :  { %14 = vsyncpa [#allocation3 + $0x1], 0 }
   0x4   :  { %15 = vsyncpa [#allocation6], 0 }
   0x5   :  { %16 = vsyncpa [#allocation4], 0 }
   0x6   :  { %18 = vsyncpa [#allocation4 + $0x1], 0 }
   0x7   :  { %19 = vsyncpa [#allocation10], 0 }
   0x8   :  { %21 = vsyncpa [#allocation10 + $0x1], 0  ;;  %s962_s21 = smov 0   ;;  %s964_s22 = smov 0  }
   0x9   :  { %s966_s23 = smov 0   ;;  %s968_s24 = smov 0  }
   0xa   :  { %s970_s25 = smov 0   ;;  %s972_s26 = smov 0  }
   0xb LB: > { %s579_s27 = sadd.s32 4294967295, %s921_s26   ;;  %p581_p0 = scmp.ge.s32.totalorder %s921_s26, 1  ;;  %s921_s26 = sphi %s972_s26, %s27_s26   ;;  %s917_s25 = sphi %s970_s25, %s1163_s25   ;;  %s913_s24 = sphi %s968_s24, %s1162_s24   ;;  %s909_s23 = sphi %s966_s23, %s1161_s23   ;;  %s905_s22 = sphi %s964_s22, %s1160_s22   ;;  %s901_s21 = sphi %s962_s21, %s1159_s21  }
   0xc   : > { %p996_p1 = scmp.eq.s32.totalorder %s579_s27, 0  ;;  %p212_p2 = scmp.lt.s32.totalorder %s921_s26, 3 }
   0xd   : > { %s1154_s1 = sld [smem:[#allocation15_spill]]  ;;  %s923_s9 = smov [#allocation5]  }
   0xe   : > { %p1004_p3 = pnand %p581_p0, %p212_p2  ;;  %s225_s10 = sshll.u32 %s923_s9, 4  ;;  %s226_s10 = int_to_ptr.vmem [resolvable:$true] %s225_s10 }
   0xf   : > { %p584_p6 = scmp.ge.s32.totalorder %s921_s26, 2  ;;  %s240_s13 = sshll.u32 %s1148_s3, 4  ;;  %s241_s13 = int_to_ptr.hbm [resolvable:$true] %s240_s13 }
  0x10   : > { %p635_p4 = pneg %p1004_p3  ;;  %s924_s14 = smov 64  }
  0x11   : > { %s925_s15 = smov 4   ;;  %s926_s16 = smov [#allocation7]  }
  0x12   : > { %p636_p5 = pnand %p635_p4, %p996_p1  ;;  %s242_s17 = sshll.u32 %s926_s16, 4  ;;  %s243_s17 = int_to_ptr.vmem [resolvable:$true] %s242_s17 }
  0x13   : > { %s223_s7 = sshll.u32 %s1154_s1, 4  ;;  %s39_s18 = sadd.s32 1, %s917_s25  ;;  %s224_s7 = int_to_ptr.hbm [resolvable:$true] %s223_s7 }
  0x14   : > { %638 = dma.hbm_to_vmem [thread:$0]  (!%p636_p5), %s224_s7, 256, %s226_s10, [#allocation6], %s924_s14, %s924_s14, %s925_s15  }
  0x15   : > { %641 = dma.hbm_to_vmem [thread:$0]  (!%p636_p5), %s241_s13, 256, %s243_s17, [#allocation6], %s924_s14, %s924_s14, %s925_s15  }
  0x16   : > { %s580_s19 = sadd.s32 4294967294, %s921_s26   ;;  %p41_p7 = scmp.ge.s32.totalorder %s39_s18, 2 }
  0x17   : > { %s48_s20 = sadd.s32 1, %s909_s23  ;;  %p55_p8 = scmp.ne.s32.totalorder %s909_s23, %s905_s22 }
  0x18   : > { %s1165_s18 = smov (%p41_p7, %s39_s18), 0  ;;  %p56_p9 = scmp.eq.s32.totalorder %s921_s26, 0 }
  0x19   : > { %p61_p10 = scmp.ne.s32.totalorder %s905_s22, %s901_s21  ;;  %s43_s29 = ssub.s32 %s917_s25, %s1165_s18 }
  0x1a   : > { %p171_p11 = scmp.eq.s32.totalorder %s579_s27, 1  ;;  %p46_p12 = scmp.eq.s32.totalorder %s43_s29, 0 }
  0x1b   : > { %p1032_p13 = por %p996_p1, %p61_p10  ;;  %p177_p2 = scmp.eq.s32.totalorder %s580_s19, 1 }
  0x1c   : > { %p1036_p0 = por %p171_p11, %p55_p8  ;;  %p57_p4 = por %p56_p9, %p55_p8 }
  0x1d   : > { %s1041_s9 = scalar_select %p46_p12, %s909_s23, %s48_s20  }
  0x1e   : > { %p1043_p5 = por %p177_p2, %p61_p10  ;;  %s259_s11 = sand.u32 1, %s909_s23  }
  0x1f   : > { %s586_s27 = sshll.u32 %s917_s25, 2  ;;  %p655_p7 = scmp.lt.s32.totalorder %s921_s26, 2 }
  0x20   : > { %s585_s12 = sshll.u32 %s259_s11, 2  ;;  %s268_s15 = scalar_lea.hbm %s1145_s0, %s586_s27 }
  0x21   : > { %s270_s16 = sshll.u32 %s268_s15, 4  ;;  %s263_s17 = scalar_lea.vmem [#allocation2], %s585_s12  ;;  %s271_s16 = int_to_ptr.hbm [resolvable:$true] %s270_s16 }
  0x22   : > { %s272_s29 = sshll.u32 %s263_s17, 4  ;;  %p643_p11 = pnand %p655_p7, %p57_p4  ;;  %s273_s29 = int_to_ptr.vmem [resolvable:$true] %s272_s29 }
  0x23   : > { %s260_s19 = scalar_lea.sflag [#allocation3], %s259_s11  ;;  %281 = sbr.rel (%p1004_p3) target bundleno = 196 (0xc4), region = 40 }
  0x24   : > { %645 = dma.hbm_to_vmem [thread:$0]  (!%p643_p11), %s271_s16, 64, %s273_s29, %s260_s19  }
  0x25   : > { %s1056_s20 = sand.u32 (!%p1004_p3), 1, %s905_s22  }
  0x26   : > { %s1059_s1 = sshll.u32 (!%p1004_p3), %s1056_s20, 2  ;;  %s284_s27 = scalar_lea.sflag (!%p1004_p3), [#allocation3], %s1056_s20 }
  0x27   : > { %s287_s12 = scalar_lea.vmem (!%p1004_p3), [#allocation2], %s1059_s1 }
  0x28   : > { %884 = dma.done.wait (%p1032_p13), %s284_s27, 64  }
  0x29   : > { %886 = vsyncadd (%p1032_p13), %s284_s27, 4294967232 }
  0x2a   : > { %888 = dma.done.wait (%p996_p1), [#allocation6], 512  }
  0x2b   : > { %890 = vsyncadd (%p996_p1), [#allocation6], 4294966784  ;;  %v618_v0 = vld [vmem:[#allocation5 + $0x8] sm:$0xff]  ;;  %v620_v1 = vld [vmem:[#allocation7 + $0x8] sm:$0xff]  ;;  %vm354_vm0 = vcmask 261120   ;;  %s613_s8 = sshll.u32 %s913_s24, 2 }
  0x2c   : > { %364 = vmatpush.bf16.msra.mxu0 %v618_v0  ;;  %397 = vmatpush.bf16.msra.mxu1 %v620_v1  ;;  %v617_v2 = vld [vmem:[#allocation5] sm:$0xff]  ;;  %v619_v3 = vld [vmem:[#allocation7] sm:$0xff]  ;;  %v333_v4 = vld [vmem:[%s287_s12] sm:$0xf]  ;;  %s426_s16 = scalar_lea.hbm %s1150_s5, %s613_s8  ;;  %s441_s19 = scalar_lea.hbm %s1151_s6, %s613_s8  ;;  %vm405_vm1 = vcmask 257024  }
  0x2d   : > { %v711_v5 = vld [vmem:[%s1147_s2] ss:$0 sm:$0xff]  ;;  %s324_s27 = scalar_lea.vmem [#allocation8], %s1059_s1  ;;  %s430_s24 = sshll.u32 %s426_s16, 4  ;;  %s431_s24 = int_to_ptr.hbm [resolvable:$true] %s430_s24 }
  0x2e   : > { %v712_v6 = vld [vmem:[%s1149_s4] ss:$0 sm:$0xff]  ;;  %s1085_s12 = sshll.u32 %s324_s27, 4  ;;  %s331_s30 = scalar_lea.vmem [#allocation9], %s1059_s1  ;;  %s429_s12 = int_to_ptr.vmem [resolvable:$true] %s1085_s12 }
  0x2f   : > { %s1088_s11 = sshll.u32 %s331_s30, 4  ;;  %s445_s28 = sshll.u32 %s441_s19, 4  ;;  %s444_s11 = int_to_ptr.vmem [resolvable:$true] %s1088_s11  ;;  %s1092_s28 = int_to_ptr.hbm [resolvable:$true] %s445_s28 }
  0x30   : > { %365 = vmatpush.bf16.msra.mxu0 %v617_v2  ;;  %398 = vmatpush.bf16.msra.mxu1 %v619_v3  ;;  %s410_s8 = scalar_lea.sflag [#allocation4], %s1056_s20  ;;  %s817_s13 = sshra.s32 %s431_s24, 4  ;;  %s818_s13 = int_to_ptr.hbm [resolvable:$true] %s817_s13 }
  0x31   : > { %s819_s14 = scalar_lea.hbm %s818_s13, 4  ;;  %s823_s16 = scalar_lea.hbm %s1150_s5, 8 }
  0x32   : > { %p820_p1 = scmp.ne.s32.totalorder %s818_s13, %s819_s14  ;;  %p824_p9 = scmp.lt.s32.totalorder %s818_s13, %s1150_s5 }
  0x33   : > { %601 = vmatmul.msk.bf16.vlgmr.msra.gmra.mxu0 %vm354_vm0, %v333_v4  ;;  %610 = vmatmul.msk.bf16.vlgmr.msra.gmra.mxu1 %vm354_vm0, %v333_v4  ;;  %p825_p10 = scmp.lt.s32.totalorder %s823_s16, %s819_s14 }
  0x34   : > { %p821_p3 = pnand %p820_p1, %p1036_p0 }
  0x35   : > { %p826_p12 = por %p825_p10, %p824_p9 }
  0x36   : > { %p822_p8 = pneg %p821_p3 }
  0x38   : > { %p827_p13 = pnand %p826_p12, %p822_p8 }
  0xb0   : > { %v367_v7 = vpop.f32.mrf.mxu0  ;;  %v400_v8 = vpop.f32.mrf.mxu1 }
  0xb1   : > { %v368_v9 = vadd.f32 %v711_v5, %v367_v7  ;;  %v401_v10 = vadd.f32 %v712_v6, %v400_v8 }
  0xb3   : > { %v404_v11 = vpack.c.bf16 %v368_v9, %v368_v9  ;;  %v407_v12 = vpack.c.bf16 %v401_v10, %v401_v10 }
  0xb5   : > { %406 = vst.msk [vmem:[%s324_s27] sm:$0xf] %vm405_vm1, %v404_v11 }
  0xb6   : > { %830 = shalt.err (!%p827_p13)
}
  0xb7   : > { %631 = dma.vmem_to_hbm [thread:$0]  (%p1036_p0), %s429_s12, 64, %s431_s24, %s410_s8   ;;  %408 = vst.msk [vmem:[%s331_s30] sm:$0xf] %vm405_vm1, %v407_v12 }
  0xb8   : > { %s415_s19 = scalar_lea.sflag [#allocation10], %s1056_s20  ;;  %s845_s27 = sshra.s32 %s1092_s28, 4  ;;  %s846_s27 = int_to_ptr.hbm [resolvable:$true] %s845_s27 }
  0xb9   : > { %s847_s1 = scalar_lea.hbm %s846_s27, 4  ;;  %s851_s15 = scalar_lea.hbm %s1151_s6, 8 }
  0xba   : > { %p848_p2 = scmp.ne.s32.totalorder %s846_s27, %s847_s1  ;;  %p852_p11 = scmp.lt.s32.totalorder %s846_s27, %s1151_s6 }
  0xbb   : > { %p853_p1 = scmp.lt.s32.totalorder %s851_s15, %s847_s1 }
  0xbc   : > { %p849_p4 = pnand %p848_p2, %p1036_p0 }
  0xbd   : > { %p854_p3 = por %p853_p1, %p852_p11 }
  0xbe   : > { %p850_p7 = pneg %p849_p4 }
  0xc0   : > { %p855_p8 = pnand %p854_p3, %p850_p7 }
  0xc2   : > { %858 = shalt.err (!%p855_p8)
}
  0xc3   : > { %632 = dma.vmem_to_hbm [thread:$0]  (%p1036_p0), %s444_s11, 64, %s1092_s28, %s415_s19   ;;  %v369_v13 = vpop.f32.mrf.mxu0  ;;  %v402_v14 = vpop.f32.mrf.mxu1 }
  0xc4 PF: > { %s457_s20 = sand.u32 1, %s901_s21   ;;  %p647_p9 = pnand %p584_p6, %p1043_p5 }
  0xc5   : > { %s458_s12 = scalar_lea.sflag [#allocation4], %s457_s20 }
  0xc6   : > { %p648_p10 = pneg %p647_p9 }
  0xc8   : > { %892 = dma.done.wait (%p648_p10), %s458_s12, 64  }
  0xc9   : > { %894 = vsyncadd (%p648_p10), %s458_s12, 4294967232  ;;  %s468_s24 = scalar_lea.sflag [#allocation10], %s457_s20 }
  0xca   : > { %896 = dma.done.wait (%p648_p10), %s468_s24, 64  }
  0xcb   : > { %898 = vsyncadd (%p648_p10), %s468_s24, 4294967232  ;;  %s27_s26 = sadd.s32 1, %s921_s26   ;;  %s1159_s21 = smov %s905_s22 }
  0xcc   : > { %p24_p0 = scmp.ge.s32.totalorder %s27_s26, 4   ;;  %s1160_s22 = smov %s909_s23 }
  0xcd   : > { %s1161_s23 = smov %s1041_s9  ;;  %s1162_s24 = smov %s917_s25 }
  0xce   : > { %s1163_s25 = smov %s1165_s18  ;;  %26 = sbr.rel (!%p24_p0) target bundleno = 11 (0xb), region = 110 }
  0xd3   :  { %474 = vsyncpa [#allocation3], 1 }
  0xd4   :  { %476 = vsyncpa [#allocation3 + $0x1], 1 }
  0xd5   :  { %477 = vsyncpa [#allocation6], 1 }
  0xd6   :  { %478 = vsyncpa [#allocation4], 1 }
  0xd7   :  { %480 = vsyncpa [#allocation4 + $0x1], 1 }
  0xd8   :  { %481 = vsyncpa [#allocation10], 1 }
  0xd9   :  { %483 = vsyncpa [#allocation10 + $0x1], 1 }

// kernel: tpu_custom_call.1
= control target key start
LH: loop header
LB: loop body
LE: loop exit
PB: predicated region body
PF: predicated region fallthrough
CT: control target
= control target key end

     0   :  { %s1145_s0 = inlined_call_operand.hbm [shape: bf16[2,8,32], index: 0, kind: input, shape index: {}]   ;;  %s1146_s1 = inlined_call_operand.hbm [shape: bf16[32,32], index: 1, kind: input, shape index: {}]   ;;  %s1147_s2 = inlined_call_operand.vmem [shape: f32[1,32], index: 2, kind: input, shape index: {}]   ;;  %s1148_s3 = inlined_call_operand.hbm [shape: bf16[32,32], index: 3, kind: input, shape index: {}]   ;;  %s1149_s4 = inlined_call_operand.vmem [shape: f32[1,32], index: 4, kind: input, shape index: {}]   ;;  %s1150_s5 = inlined_call_operand.hbm [shape: bf16[2,8,32], index: 5, kind: output, shape index: {0}]   ;;  %s1151_s6 = inlined_call_operand.hbm [shape: bf16[2,8,32], index: 6, kind: output, shape index: {1}]  }
   0x1   :  { %1152 = sst [smem:[#allocation15_spill]] %s1146_s1 }
   0x2   :  { %12 = vsyncpa [#allocation3], 0 }
   0x3   :  { %14 = vsyncpa [#allocation3 + $0x1], 0 }
   0x4   :  { %15 = vsyncpa [#allocation6], 0 }
   0x5   :  { %16 = vsyncpa [#allocation4], 0 }
   0x6   :  { %18 = vsyncpa [#allocation4 + $0x1], 0 }
   0x7   :  { %19 = vsyncpa [#allocation10], 0 }
   0x8   :  { %21 = vsyncpa [#allocation10 + $0x1], 0  ;;  %s962_s21 = smov 0   ;;  %s964_s22 = smov 0  }
   0x9   :  { %s966_s23 = smov 0   ;;  %s968_s24 = smov 0  }
   0xa   :  { %s970_s25 = smov 0   ;;  %s972_s26 = smov 0  }
   0xb LB: > { %s579_s27 = sadd.s32 4294967295, %s921_s26   ;;  %p581_p0 = scmp.ge.s32.totalorder %s921_s26, 1  ;;  %s921_s26 = sphi %s972_s26, %s27_s26   ;;  %s917_s25 = sphi %s970_s25, %s1163_s25   ;;  %s913_s24 = sphi %s968_s24, %s1162_s24   ;;  %s909_s23 = sphi %s966_s23, %s1161_s23   ;;  %s905_s22 = sphi %s964_s22, %s1160_s22   ;;  %s901_s21 = sphi %s962_s21, %s1159_s21  }
   0xc   : > { %p996_p1 = scmp.eq.s32.totalorder %s579_s27, 0  ;;  %p212_p2 = scmp.lt.s32.totalorder %s921_s26, 3 }
   0xd   : > { %s1154_s1 = sld [smem:[#allocation15_spill]]  ;;  %s923_s9 = smov [#allocation5]  }
   0xe   : > { %p1004_p3 = pnand %p581_p0, %p212_p2  ;;  %s225_s10 = sshll.u32 %s923_s9, 4  ;;  %s226_s10 = int_to_ptr.vmem [resolvable:$true] %s225_s10 }
   0xf   : > { %p584_p6 = scmp.ge.s32.totalorder %s921_s26, 2  ;;  %s240_s13 = sshll.u32 %s1148_s3, 4  ;;  %s241_s13 = int_to_ptr.hbm [resolvable:$true] %s240_s13 }
  0x10   : > { %p635_p4 = pneg %p1004_p3  ;;  %s924_s14 = smov 64  }
  0x11   : > { %s925_s15 = smov 4   ;;  %s926_s16 = smov [#allocation7]  }
  0x12   : > { %p636_p5 = pnand %p635_p4, %p996_p1  ;;  %s242_s17 = sshll.u32 %s926_s16, 4  ;;  %s243_s17 = int_to_ptr.vmem [resolvable:$true] %s242_s17 }
  0x13   : > { %s223_s7 = sshll.u32 %s1154_s1, 4  ;;  %s39_s18 = sadd.s32 1, %s917_s25  ;;  %s224_s7 = int_to_ptr.hbm [resolvable:$true] %s223_s7 }
  0x14   : > { %638 = dma.hbm_to_vmem [thread:$0]  (!%p636_p5), %s224_s7, 256, %s226_s10, [#allocation6], %s924_s14, %s924_s14, %s925_s15  }
  0x15   : > { %641 = dma.hbm_to_vmem [thread:$0]  (!%p636_p5), %s241_s13, 256, %s243_s17, [#allocation6], %s924_s14, %s924_s14, %s925_s15  }
  0x16   : > { %s580_s19 = sadd.s32 4294967294, %s921_s26   ;;  %p41_p7 = scmp.ge.s32.totalorder %s39_s18, 2 }
  0x17   : > { %s48_s20 = sadd.s32 1, %s909_s23  ;;  %p55_p8 = scmp.ne.s32.totalorder %s909_s23, %s905_s22 }
  0x18   : > { %s1165_s18 = smov (%p41_p7, %s39_s18), 0  ;;  %p56_p9 = scmp.eq.s32.totalorder %s921_s26, 0 }
  0x19   : > { %p61_p10 = scmp.ne.s32.totalorder %s905_s22, %s901_s21  ;;  %s43_s29 = ssub.s32 %s917_s25, %s1165_s18 }
  0x1a   : > { %p171_p11 = scmp.eq.s32.totalorder %s579_s27, 1  ;;  %p46_p12 = scmp.eq.s32.totalorder %s43_s29, 0 }
  0x1b   : > { %p1032_p13 = por %p996_p1, %p61_p10  ;;  %p177_p2 = scmp.eq.s32.totalorder %s580_s19, 1 }
  0x1c   : > { %p1036_p0 = por %p171_p11, %p55_p8  ;;  %p57_p4 = por %p56_p9, %p55_p8 }
  0x1d   : > { %s1041_s9 = scalar_select %p46_p12, %s909_s23, %s48_s20  }
  0x1e   : > { %p1043_p5 = por %p177_p2, %p61_p10  ;;  %s259_s11 = sand.u32 1, %s909_s23  }
  0x1f   : > { %s586_s27 = sshll.u32 %s917_s25, 2  ;;  %p655_p7 = scmp.lt.s32.totalorder %s921_s26, 2 }
  0x20   : > { %s585_s12 = sshll.u32 %s259_s11, 2  ;;  %s268_s15 = scalar_lea.hbm %s1145_s0, %s586_s27 }
  0x21   : > { %s270_s16 = sshll.u32 %s268_s15, 4  ;;  %s263_s17 = scalar_lea.vmem [#allocation2], %s585_s12  ;;  %s271_s16 = int_to_ptr.hbm [resolvable:$true] %s270_s16 }
  0x22   : > { %s272_s29 = sshll.u32 %s263_s17, 4  ;;  %p643_p11 = pnand %p655_p7, %p57_p4  ;;  %s273_s29 = int_to_ptr.vmem [resolvable:$true] %s272_s29 }
  0x23   : > { %s260_s19 = scalar_lea.sflag [#allocation3], %s259_s11  ;;  %281 = sbr.rel (%p1004_p3) target bundleno = 196 (0xc4), region = 40 }
  0x24   : > { %645 = dma.hbm_to_vmem [thread:$0]  (!%p643_p11), %s271_s16, 64, %s273_s29, %s260_s19  }
  0x25   : > { %s1056_s20 = sand.u32 (!%p1004_p3), 1, %s905_s22  }
  0x26   : > { %s1059_s1 = sshll.u32 (!%p1004_p3), %s1056_s20, 2  ;;  %s284_s27 = scalar_lea.sflag (!%p1004_p3), [#allocation3], %s1056_s20 }
  0x27   : > { %s287_s12 = scalar_lea.vmem (!%p1004_p3), [#allocation2], %s1059_s1 }
  0x28   : > { %884 = dma.done.wait (%p1032_p13), %s284_s27, 64  }
  0x29   : > { %886 = vsyncadd (%p1032_p13), %s284_s27, 4294967232 }
  0x2a   : > { %888 = dma.done.wait (%p996_p1), [#allocation6], 512  }
  0x2b   : > { %890 = vsyncadd (%p996_p1), [#allocation6], 4294966784  ;;  %v618_v0 = vld [vmem:[#allocation5 + $0x8] sm:$0xff]  ;;  %v620_v1 = vld [vmem:[#allocation7 + $0x8] sm:$0xff]  ;;  %vm354_vm0 = vcmask 261120   ;;  %s613_s8 = sshll.u32 %s913_s24, 2 }
  0x2c   : > { %364 = vmatpush.bf16.msra.mxu0 %v618_v0  ;;  %397 = vmatpush.bf16.msra.mxu1 %v620_v1  ;;  %v617_v2 = vld [vmem:[#allocation5] sm:$0xff]  ;;  %v619_v3 = vld [vmem:[#allocation7] sm:$0xff]  ;;  %v333_v4 = vld [vmem:[%s287_s12] sm:$0xf]  ;;  %s426_s16 = scalar_lea.hbm %s1150_s5, %s613_s8  ;;  %s441_s19 = scalar_lea.hbm %s1151_s6, %s613_s8  ;;  %vm405_vm1 = vcmask 257024  }
  0x2d   : > { %v711_v5 = vld [vmem:[%s1147_s2] ss:$0 sm:$0xff]  ;;  %s324_s27 = scalar_lea.vmem [#allocation8], %s1059_s1  ;;  %s430_s24 = sshll.u32 %s426_s16, 4  ;;  %s431_s24 = int_to_ptr.hbm [resolvable:$true] %s430_s24 }
  0x2e   : > { %v712_v6 = vld [vmem:[%s1149_s4] ss:$0 sm:$0xff]  ;;  %s1085_s12 = sshll.u32 %s324_s27, 4  ;;  %s331_s30 = scalar_lea.vmem [#allocation9], %s1059_s1  ;;  %s429_s12 = int_to_ptr.vmem [resolvable:$true] %s1085_s12 }
  0x2f   : > { %s1088_s11 = sshll.u32 %s331_s30, 4  ;;  %s445_s28 = sshll.u32 %s441_s19, 4  ;;  %s444_s11 = int_to_ptr.vmem [resolvable:$true] %s1088_s11  ;;  %s1092_s28 = int_to_ptr.hbm [resolvable:$true] %s445_s28 }
  0x30   : > { %365 = vmatpush.bf16.msra.mxu0 %v617_v2  ;;  %398 = vmatpush.bf16.msra.mxu1 %v619_v3  ;;  %s410_s8 = scalar_lea.sflag [#allocation4], %s1056_s20  ;;  %s817_s13 = sshra.s32 %s431_s24, 4  ;;  %s818_s13 = int_to_ptr.hbm [resolvable:$true] %s817_s13 }
  0x31   : > { %s819_s14 = scalar_lea.hbm %s818_s13, 4  ;;  %s823_s16 = scalar_lea.hbm %s1150_s5, 8 }
  0x32   : > { %p820_p1 = scmp.ne.s32.totalorder %s818_s13, %s819_s14  ;;  %p824_p9 = scmp.lt.s32.totalorder %s818_s13, %s1150_s5 }
  0x33   : > { %601 = vmatmul.msk.bf16.vlgmr.msra.gmra.mxu0 %vm354_vm0, %v333_v4  ;;  %610 = vmatmul.msk.bf16.vlgmr.msra.gmra.mxu1 %vm354_vm0, %v333_v4  ;;  %p825_p10 = scmp.lt.s32.totalorder %s823_s16, %s819_s14 }
  0x34   : > { %p821_p3 = pnand %p820_p1, %p1036_p0 }
  0x35   : > { %p826_p12 = por %p825_p10, %p824_p9 }
  0x36   : > { %p822_p8 = pneg %p821_p3 }
  0x38   : > { %p827_p13 = pnand %p826_p12, %p822_p8 }
  0xb0   : > { %v367_v7 = vpop.f32.mrf.mxu0  ;;  %v400_v8 = vpop.f32.mrf.mxu1 }
  0xb1   : > { %v368_v9 = vadd.f32 %v711_v5, %v367_v7  ;;  %v401_v10 = vadd.f32 %v712_v6, %v400_v8 }
  0xb3   : > { %v404_v11 = vpack.c.bf16 %v368_v9, %v368_v9  ;;  %v407_v12 = vpack.c.bf16 %v401_v10, %v401_v10 }
  0xb5   : > { %406 = vst.msk [vmem:[%s324_s27] sm:$0xf] %vm405_vm1, %v404_v11 }
  0xb6   : > { %830 = shalt.err (!%p827_p13)
}
  0xb7   : > { %631 = dma.vmem_to_hbm [thread:$0]  (%p1036_p0), %s429_s12, 64, %s431_s24, %s410_s8   ;;  %408 = vst.msk [vmem:[%s331_s30] sm:$0xf] %vm405_vm1, %v407_v12 }
  0xb8   : > { %s415_s19 = scalar_lea.sflag [#allocation10], %s1056_s20  ;;  %s845_s27 = sshra.s32 %s1092_s28, 4  ;;  %s846_s27 = int_to_ptr.hbm [resolvable:$true] %s845_s27 }
  0xb9   : > { %s847_s1 = scalar_lea.hbm %s846_s27, 4  ;;  %s851_s15 = scalar_lea.hbm %s1151_s6, 8 }
  0xba   : > { %p848_p2 = scmp.ne.s32.totalorder %s846_s27, %s847_s1  ;;  %p852_p11 = scmp.lt.s32.totalorder %s846_s27, %s1151_s6 }
  0xbb   : > { %p853_p1 = scmp.lt.s32.totalorder %s851_s15, %s847_s1 }
  0xbc   : > { %p849_p4 = pnand %p848_p2, %p1036_p0 }
  0xbd   : > { %p854_p3 = por %p853_p1, %p852_p11 }
  0xbe   : > { %p850_p7 = pneg %p849_p4 }
  0xc0   : > { %p855_p8 = pnand %p854_p3, %p850_p7 }
  0xc2   : > { %858 = shalt.err (!%p855_p8)
}
  0xc3   : > { %632 = dma.vmem_to_hbm [thread:$0]  (%p1036_p0), %s444_s11, 64, %s1092_s28, %s415_s19   ;;  %v369_v13 = vpop.f32.mrf.mxu0  ;;  %v402_v14 = vpop.f32.mrf.mxu1 }
  0xc4 PF: > { %s457_s20 = sand.u32 1, %s901_s21   ;;  %p647_p9 = pnand %p584_p6, %p1043_p5 }
  0xc5   : > { %s458_s12 = scalar_lea.sflag [#allocation4], %s457_s20 }
  0xc6   : > { %p648_p10 = pneg %p647_p9 }
  0xc8   : > { %892 = dma.done.wait (%p648_p10), %s458_s12, 64  }
  0xc9   : > { %894 = vsyncadd (%p648_p10), %s458_s12, 4294967232  ;;  %s468_s24 = scalar_lea.sflag [#allocation10], %s457_s20 }
  0xca   : > { %896 = dma.done.wait (%p648_p10), %s468_s24, 64  }
  0xcb   : > { %898 = vsyncadd (%p648_p10), %s468_s24, 4294967232  ;;  %s27_s26 = sadd.s32 1, %s921_s26   ;;  %s1159_s21 = smov %s905_s22 }
  0xcc   : > { %p24_p0 = scmp.ge.s32.totalorder %s27_s26, 4   ;;  %s1160_s22 = smov %s909_s23 }
  0xcd   : > { %s1161_s23 = smov %s1041_s9  ;;  %s1162_s24 = smov %s917_s25 }
  0xce   : > { %s1163_s25 = smov %s1165_s18  ;;  %26 = sbr.rel (!%p24_p0) target bundleno = 11 (0xb), region = 110 }
  0xd3   :  { %474 = vsyncpa [#allocation3], 1 }
  0xd4   :  { %476 = vsyncpa [#allocation3 + $0x1], 1 }
  0xd5   :  { %477 = vsyncpa [#allocation6], 1 }
  0xd6   :  { %478 = vsyncpa [#allocation4], 1 }
  0xd7   :  { %480 = vsyncpa [#allocation4 + $0x1], 1 }
  0xd8   :  { %481 = vsyncpa [#allocation10], 1 }
  0xd9   :  { %483 = vsyncpa [#allocation10 + $0x1], 1 }

</bundles_post_ra>
